<compile_context>
chip_gen: v5e
topology: v5e:2x2
jax: 0.10.0
libtpu: 0.0.40
codegen_flags: <defaults>
</compile_context>

<pallas_src>
import functools

import jax
import jax.numpy as jnp
from jax import lax
from jax.experimental import pallas as pl
from jax.experimental.pallas import tpu as pltpu


# ----------------------------------------------------------------------------- config / helpers

def _pick_vmem_limit():
    """Per-generation scoped-VMEM budget: ~3/4 of physical (48MiB on v7x, 96MiB on v5e/v6e)."""
    cap = 64 * 1024 * 1024
    try:
        info = pltpu.get_tpu_info()
        cap = int(getattr(info, "vmem_capacity_bytes", None) or cap)
    except Exception:
        pass
    return min(int(cap * 3 // 4), 100 * 1024 * 1024)


_VMEM_LIMIT = _pick_vmem_limit()

try:
    _KIND = jax.devices()[0].device_kind.lower()
except Exception:
    _KIND = ""
# v5e's MXU is 128x128: tm=128 loses no MXU utilization and halves f32 intermediates.
_DEFAULT_TM = 128 if ("v5 lite" in _KIND or "v5e" in _KIND or "v5 l" in _KIND) else 256


def _round_up(x, m):
    return ((x + m - 1) // m) * m


def _pad2d(x, rows, cols):
    r, c = x.shape
    if r == rows and c == cols:
        return x
    return jnp.pad(x, ((0, rows - r), (0, cols - c)))


def _gelu_f32(x):
    # tanh-approx GELU, kept in f32 for the VPU/EUP epilogue.
    # TODO(synk): PyTorch nn.GELU defaults to the exact erf form (small numerical drift).
    c = 0.7978845608028654  # sqrt(2/pi)
    return 0.5 * x * (1.0 + jnp.tanh(c * (x + 0.044715 * x * x * x)))


def _bias2d(b, n):
    return b.reshape(1, n).astype(jnp.float32)


# ----------------------------------------------------------------------------- matmul kernel

def _matmul_kernel(x_ref, w_ref, b_ref, o_ref, acc_ref, *, act):
    @pl.when(pl.program_id(2) == 0)
    def _init():
        acc_ref[...] = jnp.zeros_like(acc_ref)

    acc_ref[...] += jnp.dot(x_ref[...], w_ref[...],
                            preferred_element_type=jnp.float32)

    @pl.when(pl.program_id(2) == pl.num_programs(2) - 1)
    def _finalize():
        y = acc_ref[...] + b_ref[...]
        if act == "gelu":
            y = _gelu_f32(y)
        o_ref[...] = y.astype(o_ref.dtype)


def linear(x, w, b=None, act=None, out_dtype=jnp.bfloat16, tm=None, tn=512, tk=512):
    """Tiled x @ w + b (+GELU).  x: [M, K]; w: [K, N] (bf16).  bf16 MXU inputs / f32 acc,
    bf16 output by default so inter-kernel HBM hops are half-width."""
    M, K = x.shape
    N = w.shape[1]
    tm = tm or _DEFAULT_TM
    tm = min(tm, _round_up(M, 8))
    tn = min(tn, _round_up(N, 128))
    tk = min(tk, _round_up(K, 128))
    Mp, Kp, Np = _round_up(M, tm), _round_up(K, tk), _round_up(N, tn)
    if b is None:
        b2d = jnp.zeros((1, N), jnp.float32)
    else:
        b2d = _bias2d(b, N)
    xp = _pad2d(x, Mp, Kp).astype(jnp.bfloat16)
    wp = _pad2d(w, Kp, Np).astype(jnp.bfloat16)
    bp = _pad2d(b2d, 1, Np)
    out = pl.pallas_call(
        functools.partial(_matmul_kernel, act=act),
        out_shape=jax.ShapeDtypeStruct((Mp, Np), out_dtype),
        grid=(Mp // tm, Np // tn, Kp // tk),
        in_specs=[
            pl.BlockSpec((tm, tk), lambda i, j, k: (i, k)),
            pl.BlockSpec((tk, tn), lambda i, j, k: (k, j)),
            pl.BlockSpec((1, tn), lambda i, j, k: (0, j)),
        ],
        out_specs=pl.BlockSpec((tm, tn), lambda i, j, k: (i, j)),
        scratch_shapes=[pltpu.VMEM((tm, tn), jnp.float32)],
        compiler_params=pltpu.CompilerParams(
            dimension_semantics=("parallel", "parallel", "arbitrary"),
            vmem_limit_bytes=_VMEM_LIMIT),
    )(xp, wp, bp)
    return out[:M, :N]


# ----------------------------------------------------------------------------- fused head MLP

def _head_mlp_kernel(x_ref, w1_ref, b1_ref, w2_ref, b2_ref, w3_ref, b3_ref,
                     raw_ref, nrm_ref):
    h = jnp.dot(x_ref[...], w1_ref[...], preferred_element_type=jnp.float32) + b1_ref[...]
    h = _gelu_f32(h)
    h = jnp.dot(h.astype(w2_ref.dtype), w2_ref[...],
                preferred_element_type=jnp.float32) + b2_ref[...]
    h = _gelu_f32(h)
    h = jnp.dot(h.astype(w3_ref.dtype), w3_ref[...],
                preferred_element_type=jnp.float32) + b3_ref[...]
    raw_ref[...] = h.astype(raw_ref.dtype)                       # pre-normalize (hook output)
    # fused F.normalize(h, dim=-1): rsqrt goes to the EUP slot (no f32 divide on the VPU)
    sumsq = jnp.sum(h * h, axis=-1, keepdims=True)
    inv = lax.rsqrt(jnp.maximum(sumsq, 1e-24))                   # eps^2 of F.normalize's 1e-12
    nrm_ref[...] = (h * inv).astype(nrm_ref.dtype)


def head_mlp(x, w1, b1, w2, b2, w3, b3, tm=None):
    """Fused 3-layer MLP + L2-normalize epilogue; intermediates stay in VMEM.
    Returns (raw_bottleneck_bf16, normalized_bottleneck_bf16)."""
    M, D = x.shape
    H1, H2, BK = w1.shape[1], w2.shape[1], w3.shape[1]
    tm = tm or _DEFAULT_TM
    tm = min(tm, _round_up(M, 8))
    Mp = _round_up(M, tm)
    xp = _pad2d(x, Mp, D).astype(jnp.bfloat16)
    # TODO(synk): at production head dims (D~768, hidden~2048) single-buffer the constant-index
    # weight blocks (pipeline_mode) or shrink tm to stay inside v7x's 64 MiB VMEM.
    raw, nrm = pl.pallas_call(
        _head_mlp_kernel,
        out_shape=(jax.ShapeDtypeStruct((Mp, BK), jnp.bfloat16),
                   jax.ShapeDtypeStruct((Mp, BK), jnp.bfloat16)),
        grid=(Mp // tm,),
        in_specs=[
            pl.BlockSpec((tm, D), lambda i: (i, 0)),
            pl.BlockSpec((D, H1), lambda i: (0, 0)),
            pl.BlockSpec((1, H1), lambda i: (0, 0)),
            pl.BlockSpec((H1, H2), lambda i: (0, 0)),
            pl.BlockSpec((1, H2), lambda i: (0, 0)),
            pl.BlockSpec((H2, BK), lambda i: (0, 0)),
            pl.BlockSpec((1, BK), lambda i: (0, 0)),
        ],
        out_specs=[pl.BlockSpec((tm, BK), lambda i: (i, 0)),
                   pl.BlockSpec((tm, BK), lambda i: (i, 0))],
        compiler_params=pltpu.CompilerParams(
            dimension_semantics=("parallel",),
            vmem_limit_bytes=_VMEM_LIMIT),
    )(xp,
      w1.astype(jnp.bfloat16), _bias2d(b1, H1),
      w2.astype(jnp.bfloat16), _bias2d(b2, H2),
      w3.astype(jnp.bfloat16), _bias2d(b3, BK))
    return raw[:M], nrm[:M]


# ----------------------------------------------------------------------------- loss kernels

def _center_softmax_kernel(t_ref, c_ref, o_ref, *, temp):
    t = (t_ref[...].astype(jnp.float32) - c_ref[...]) * (1.0 / temp)
    t = t - jnp.max(t, axis=-1, keepdims=True)
    e = jnp.exp(t)
    inv = pl.reciprocal(jnp.sum(e, axis=-1, keepdims=True), approx=True)
    o_ref[...] = (e * inv).astype(o_ref.dtype)


def center_softmax(t, center, temp, tr=256):
    """softmax((t - center) / temp) per row.  t: [R, C] (bf16); center: [1, C] (f32) -> bf16."""
    R, C = t.shape
    tr = min(tr, _round_up(R, 8))
    Rp = _round_up(R, tr)
    tp = _pad2d(t, Rp, C)
    out = pl.pallas_call(
        functools.partial(_center_softmax_kernel, temp=temp),
        out_shape=jax.ShapeDtypeStruct((Rp, C), jnp.bfloat16),
        grid=(Rp // tr,),
        in_specs=[
            pl.BlockSpec((tr, C), lambda r: (r, 0)),
            pl.BlockSpec((1, C), lambda r: (0, 0)),
        ],
        out_specs=pl.BlockSpec((tr, C), lambda r: (r, 0)),
        compiler_params=pltpu.CompilerParams(
            dimension_semantics=("parallel",),
            vmem_limit_bytes=_VMEM_LIMIT),
    )(tp, center.astype(jnp.float32))
    return out[:R]


def _store_block_scalar(o_ref, part):
    # lane-aligned (8,128) unmasked store: partial sum in (0,0), zeros elsewhere.
    sub = lax.broadcasted_iota(jnp.int32, o_ref.shape, 0)
    lane = lax.broadcasted_iota(jnp.int32, o_ref.shape, 1)
    o_ref[...] = jnp.where((sub == 0) & (lane == 0), part, 0.0)


def _student_lse(s_scaled):
    m = jnp.max(s_scaled, axis=-1, keepdims=True)
    return m + jnp.log(jnp.sum(jnp.exp(s_scaled - m), axis=-1, keepdims=True))


def _ce_probs_sum_kernel(tp_ref, s_ref, w_ref, o_ref, *, student_temp):
    tp = tp_ref[...].astype(jnp.float32)
    s = s_ref[...].astype(jnp.float32) * (1.0 / student_temp)
    # -sum(tp*log_softmax(s)) == lse(s) - sum(tp*s)   (sum(tp)==1); no logp materialized
    row_loss = _student_lse(s) - jnp.sum(tp * s, axis=-1, keepdims=True)
    part = jnp.sum(row_loss * w_ref[...], keepdims=True)            # (1,1)
    _store_block_scalar(o_ref, part)


def _ce_logits_sum_kernel(t_ref, c_ref, s_ref, w_ref, o_ref, *, teacher_temp, student_temp):
    t = (t_ref[...].astype(jnp.float32) - c_ref[...]) * (1.0 / teacher_temp)
    t = t - jnp.max(t, axis=-1, keepdims=True)
    e = jnp.exp(t)
    den = jnp.sum(e, axis=-1, keepdims=True)                        # (tr,1)
    s = s_ref[...].astype(jnp.float32) * (1.0 / student_temp)
    num = jnp.sum(e * s, axis=-1, keepdims=True)                    # (tr,1)
    # -sum(softmax(t)*log_softmax(s)) == lse(s) - sum(e*s)/sum(e); teacher probs never formed
    row_loss = _student_lse(s) - num / den
    part = jnp.sum(row_loss * w_ref[...], keepdims=True)            # (1,1)
    _store_block_scalar(o_ref, part)


def ce_weighted_sum_probs(t_probs, s_logits, row_w, student_temp, tr=256):
    """sum_r row_w[r] * CE(t_probs[r], log_softmax(s[r]/Ts)) -> scalar (per-block partials)."""
    R, C = s_logits.shape
    tr = min(tr, _round_up(R, 8))
    Rp = _round_up(R, tr)
    nblk = Rp // tr
    out = pl.pallas_call(
        functools.partial(_ce_probs_sum_kernel, student_temp=student_temp),
        out_shape=jax.ShapeDtypeStruct((nblk * 8, 128), jnp.float32),
        grid=(nblk,),
        in_specs=[
            pl.BlockSpec((tr, C), lambda r: (r, 0)),
            pl.BlockSpec((tr, C), lambda r: (r, 0)),
            pl.BlockSpec((tr, 1), lambda r: (r, 0)),
        ],
        out_specs=pl.BlockSpec((8, 128), lambda r: (r, 0)),
        compiler_params=pltpu.CompilerParams(
            dimension_semantics=("parallel",),
            vmem_limit_bytes=_VMEM_LIMIT),
    )(_pad2d(t_probs, Rp, C).astype(jnp.bfloat16),
      _pad2d(s_logits, Rp, C).astype(jnp.bfloat16),
      _pad2d(row_w.reshape(R, 1).astype(jnp.float32), Rp, 1))
    return jnp.sum(out)


def ce_weighted_sum_logits(t_logits, center, s_logits, row_w,
                           teacher_temp, student_temp, tr=256):
    """Teacher softmax fused in-kernel (each teacher_patch chunk is consumed exactly once)."""
    R, C = s_logits.shape
    tr = min(tr, _round_up(R, 8))
    Rp = _round_up(R, tr)
    nblk = Rp // tr
    out = pl.pallas_call(
        functools.partial(_ce_logits_sum_kernel,
                          teacher_temp=teacher_temp, student_temp=student_temp),
        out_shape=jax.ShapeDtypeStruct((nblk * 8, 128), jnp.float32),
        grid=(nblk,),
        in_specs=[
            pl.BlockSpec((tr, C), lambda r: (r, 0)),
            pl.BlockSpec((1, C), lambda r: (0, 0)),
            pl.BlockSpec((tr, C), lambda r: (r, 0)),
            pl.BlockSpec((tr, 1), lambda r: (r, 0)),
        ],
        out_specs=pl.BlockSpec((8, 128), lambda r: (r, 0)),
        compiler_params=pltpu.CompilerParams(
            dimension_semantics=("parallel",),
            vmem_limit_bytes=_VMEM_LIMIT),
    )(_pad2d(t_logits, Rp, C).astype(jnp.bfloat16), center.astype(jnp.float32),
      _pad2d(s_logits, Rp, C).astype(jnp.bfloat16),
      _pad2d(row_w.reshape(R, 1).astype(jnp.float32), Rp, 1))
    return jnp.sum(out)


# ----------------------------------------------------------------------------- kernel params

def _prep_backbone(p):
    D = p["patch_w"].shape[1]
    return {
        "patch_w": p["patch_w"].astype(jnp.bfloat16),
        "patch_b": _bias2d(p["patch_b"], D),
        "cls_token": p["cls_token"].astype(jnp.bfloat16),
        "pos_embed": p["pos_embed"].astype(jnp.bfloat16),
        "mask_token": p["mask_token"].astype(jnp.bfloat16),
    }


def _prep_head(p):
    # weight_norm(v, g=1): column normalisation hoisted out, done ONCE per step in f32.
    v = p["last_v"]
    vn = v * lax.rsqrt(jnp.maximum(jnp.sum(v * v, axis=0, keepdims=True), 1e-24))
    return {
        "w1": p["w1"].astype(jnp.bfloat16), "b1": _bias2d(p["b1"], p["w1"].shape[1]),
        "w2": p["w2"].astype(jnp.bfloat16), "b2": _bias2d(p["b2"], p["w2"].shape[1]),
        "w3": p["w3"].astype(jnp.bfloat16), "b3": _bias2d(p["b3"], p["w3"].shape[1]),
        "vn": vn.astype(jnp.bfloat16),
    }


# ----------------------------------------------------------------------------- model pieces

def extract_patches(imgs, patch):
    # NCHW -> [N, P, C*patch*patch] with (C, ph, pw) flattening (matches Conv2d weight flatten)
    N, C, H, W = imgs.shape
    ph, pw = H // patch, W // patch
    x = imgs.reshape(N, C, ph, patch, pw, patch)
    x = x.transpose(0, 2, 4, 1, 3, 5)
    return x.reshape(N, ph * pw, C * patch * patch)


def backbone_forward(params_k, imgs, mask, patch):
    """Minimal ViT-like backbone: patch embed (tiled Pallas matmul, bf16 out) + cls token +
    pos embed.  mask: [N, P] bool or None (masked tokens replaced by mask_token, as in iBOT)."""
    N = imgs.shape[0]
    patches = extract_patches(imgs, patch)
    P, Cpp = patches.shape[1], patches.shape[2]
    D = params_k["patch_w"].shape[1]
    tok = linear(patches.reshape(N * P, Cpp), params_k["patch_w"], params_k["patch_b"],
                 out_dtype=jnp.bfloat16)
    tok = tok.reshape(N, P, D)
    if mask is not None:
        tok = jnp.where(mask[:, :, None], params_k["mask_token"], tok)
    cls = jnp.broadcast_to(params_k["cls_token"], (N, 1, D))
    x = jnp.concatenate([cls, tok], axis=1) + params_k["pos_embed"]
    # TODO(synk): the external ViT teacher/student transformer blocks are constructor
    # arguments of iBOT (not defined by the module) and are not replicated here.
    return x


def head_forward(params_k, tokens):
    """iBOTHead (shared_head=True): fused MLP+L2-normalize -> weight-normalized shared last
    layer (plain bf16 matmul) on ALL tokens in one tiled call; split into (cls, patch)."""
    B, T, D = tokens.shape
    x = tokens.reshape(B * T, D)
    raw, xn = head_mlp(x, params_k["w1"], params_k["b1"], params_k["w2"], params_k["b2"],
                       params_k["w3"], params_k["b3"])
    raw_out = raw.reshape(B, T, -1)

    # forward-hook equivalents (captured on the mlp's input / raw output, pre-normalize)
    hooks = {
        "entangled_cls_emb": tokens[:, 0].astype(jnp.float32),
        "entangled_mean_emb": jnp.mean(tokens[:, 1:].astype(jnp.float32), axis=1),
        "inst_cls_emb": raw_out[:, 0].astype(jnp.float32),
        "inst_mean_emb": jnp.mean(raw_out[:, 1:].astype(jnp.float32), axis=1),
    }

    logits = linear(xn, params_k["vn"], b=None, out_dtype=jnp.bfloat16).reshape(B, T, -1)
    return logits[:, 0], logits[:, 1:], hooks


def ibot_get_loss(student_output, teacher_output, student_mask, center, center2, cfg):
    s_cls, s_patch = student_output
    t_cls, t_patch = teacher_output
    gcn = cfg["global_crops_number"]
    ncrops = cfg["ncrops"]
    N = t_cls.shape[0] // gcn
    P = t_patch.shape[1]
    pdim = t_patch.shape[-1]
    cdim = t_cls.shape[-1]

    # teacher cls softmax precomputed ONCE (bf16) and reused for every (q, v != q) pair.
    t_cls_probs = center_softmax(t_cls, center.reshape(1, cdim), cfg["cls_temperature"])
    center2_2d = center2.reshape(1, pdim)
    uniform_w = jnp.full((N,), 1.0 / N, jnp.float32)

    total1, n1 = 0.0, 0
    total2, n2 = 0.0, 0
    for q in range(gcn):
        tp_q = t_cls_probs[q * N:(q + 1) * N]
        for v in range(ncrops):
            if v == q:
                # masked-patch loss: per-row weights fold mask / per-image count / batch mean.
                # TODO(synk): gather only masked rows via PrefetchScalarGridSpec to skip ~70%
                # of the rows at production mask ratios (HBM-bound kernel).
                t_patch_q = t_patch[q * N:(q + 1) * N].reshape(N * P, pdim)
                s_patch_v = s_patch[v * N:(v + 1) * N].reshape(N * P, pdim)
                m = student_mask[v].reshape(N, P).astype(jnp.float32)
                w = m / jnp.maximum(jnp.sum(m, axis=-1, keepdims=True), 1.0) / N
                total2 = total2 + ce_weighted_sum_logits(
                    t_patch_q, center2_2d, s_patch_v, w.reshape(N * P),
                    cfg["patch_temperature"], cfg["student_temperature"])
                n2 += 1
            else:
                s_cls_v = s_cls[v * N:(v + 1) * N]
                total1 = total1 + ce_weighted_sum_probs(
                    tp_q, s_cls_v, uniform_w, cfg["student_temperature"])
                n1 += 1

    total1 = total1 / n1 * cfg["lambda1"]
    total2 = total2 / n2 * cfg["lambda2"]

    # update_center (single device: dist.all_reduce / world_size == 1 omitted); f32 reductions
    cm, cm2 = cfg["center_momentum"], cfg["center_momentum2"]
    t_cls32 = t_cls.astype(jnp.float32)
    t_patch32 = t_patch.astype(jnp.float32)
    cls_center = jnp.sum(t_cls32, axis=0, keepdims=True) / t_cls.shape[0]
    new_center = center * cm + cls_center * (1.0 - cm)
    patch_center = jnp.sum(jnp.mean(t_patch32, axis=1), axis=0, keepdims=True) / t_patch.shape[0]
    new_center2 = center2 * cm2 + patch_center[:, None, :] * (1.0 - cm2)

    loss_dict = {"cls": total1, "patch": total2, "loss": total1 + total2}
    return loss_dict, new_center, new_center2


def ibot_forward(state, imgs, masks, cfg, return_hooks=True):
    """Functional equivalent of iBOT.forward.  Returns (output_dict, new_state)."""
    # momentum_update_teacher (EMA over common params: backbone + head), f32 masters
    m = cfg["teacher_momentum"]
    teacher = jax.tree_util.tree_map(
        lambda pk, pq: pk * m + (1.0 - m) * pq, state["teacher"], state["student"])
    student = state["student"]

    # per-step kernel params: bf16 weights / (1,N) f32 biases / normalized WN columns;
    # teacher cast fuses with the EMA, so no extra per-kernel cast+pad pass over the weights.
    teacher_k = {"backbone": _prep_backbone(teacher["backbone"]),
                 "head": _prep_head(teacher["head"])}
    student_k = {"backbone": _prep_backbone(student["backbone"]),
                 "head": _prep_head(student["head"])}

    gcn = cfg["global_crops_number"]
    N = imgs[0].shape[0]
    imgs_global = jnp.concatenate(imgs[:gcn], axis=0)                    # [gcn*N, C, H, W]
    masks_global = jnp.concatenate(
        [mk.reshape(mk.shape[0], -1) for mk in masks[:gcn]], axis=0)     # [gcn*N, P]

    # teacher / student forward (MultiCropWrapper concatenates same-resolution crops)
    t_tokens = backbone_forward(teacher_k["backbone"], imgs_global, None, cfg["patch"])
    t_cls, t_patch, _ = head_forward(teacher_k["head"], t_tokens)
    s_tokens = backbone_forward(student_k["backbone"], imgs_global, masks_global, cfg["patch"])
    s_cls, s_patch, hooks = head_forward(student_k["head"], s_tokens)

    embedding_dict = {k: [v[:N]] for k, v in hooks.items()}
    # TODO(synk): local crops (student_local_cls) not exercised here (local_crops_number=0).

    loss_dict, new_center, new_center2 = ibot_get_loss(
        (s_cls, s_patch), (t_cls, t_patch), masks, state["center"], state["center2"], cfg)

    output = dict(loss_dict)
    output["probs_teacher"] = tuple(t_cls[c * N:(c + 1) * N] for c in range(gcn))
    output["probs_student"] = tuple(s_cls[c * N:(c + 1) * N] for c in range(gcn))
    if return_hooks:
        output["embeddings"] = embedding_dict

    new_state = {"teacher": teacher, "student": student,
                 "center": new_center, "center2": new_center2}
    return output, new_state


# ----------------------------------------------------------------------------- init

def init_backbone(key, C, patch, P, D):
    k1, k2, k3, k4 = jax.random.split(key, 4)
    return {
        # weights stored pre-transposed ([in, out]) so kernels never transpose per call
        "patch_w": 0.02 * jax.random.normal(k1, (C * patch * patch, D), jnp.float32),
        "patch_b": jnp.zeros((D,), jnp.float32),
        "cls_token": 0.02 * jax.random.normal(k2, (1, 1, D), jnp.float32),
        "pos_embed": 0.02 * jax.random.normal(k3, (1, 1 + P, D), jnp.float32),
        "mask_token": 0.02 * jax.random.normal(k4, (1, 1, D), jnp.float32),
    }


def init_head(key, D, hidden, bottleneck, out_dim):
    ks = jax.random.split(key, 4)
    return {
        "w1": 0.02 * jax.random.normal(ks[0], (D, hidden), jnp.float32),
        "b1": jnp.zeros((hidden,), jnp.float32),
        "w2": 0.02 * jax.random.normal(ks[1], (hidden, hidden), jnp.float32),
        "b2": jnp.zeros((hidden,), jnp.float32),
        "w3": 0.02 * jax.random.normal(ks[2], (hidden, bottleneck), jnp.float32),
        "b3": jnp.zeros((bottleneck,), jnp.float32),
        "last_v": 0.02 * jax.random.normal(ks[3], (bottleneck, out_dim), jnp.float32),
    }


# ----------------------------------------------------------------------------- main

if __name__ == "__main__":
    key = jax.random.PRNGKey(0)
    N, C, H, W, patch = 2, 3, 32, 32, 8
    ph, pw = H // patch, W // patch
    P = ph * pw                                   # 16 patches (+1 cls token)
    D, hidden, bottleneck = 128, 256, 128         # lane-aligned demo dims
    out_dim = patch_out_dim = 256
    gcn = 2

    cfg = dict(
        patch=patch,
        global_crops_number=gcn,
        local_crops_number=0,
        ncrops=gcn + 0,
        student_temperature=0.1,
        cls_temperature=0.07,
        patch_temperature=0.07,
        center_momentum=0.9,
        center_momentum2=0.9,
        teacher_momentum=0.996,
        lambda1=1.0,
        lambda2=1.0,
    )

    keys = jax.random.split(key, 8)
    student_backbone = init_backbone(keys[0], C, patch, P, D)
    # teacher backbone is copied from the student (load_state_dict in __init__)
    teacher_backbone = jax.tree_util.tree_map(lambda x: x, student_backbone)
    state = {
        "student": {"backbone": student_backbone,
                    "head": init_head(keys[1], D, hidden, bottleneck, out_dim)},
        "teacher": {"backbone": teacher_backbone,
                    "head": init_head(keys[2], D, hidden, bottleneck, out_dim)},
        "center": jnp.zeros((1, out_dim), jnp.float32),
        "center2": jnp.zeros((1, 1, patch_out_dim), jnp.float32),
    }

    imgs = [jax.random.normal(keys[3], (N, C, H, W), jnp.float32),
            jax.random.normal(keys[4], (N, C, H, W), jnp.float32)]
    masks = [jax.random.bernoulli(keys[5], 0.3, (N, ph, pw)),
             jax.random.bernoulli(keys[6], 0.3, (N, ph, pw))]

    output, new_state = ibot_forward(state, imgs, masks, cfg, return_hooks=True)
    jax.block_until_ready(output["loss"])
    jax.block_until_ready(new_state["center"])
    print("KERNEL_OK")
</pallas_src>

<mosaic_0001>
module attributes {stable_mosaic.version = 11 : i64} {
  func.func @_matmul_kernel(%arg0: i32, %arg1: i32, %arg2: i32, %arg3: memref<64x256xbf16, #tpu.memory_space<vmem>>, %arg4: memref<256x128xbf16, #tpu.memory_space<vmem>>, %arg5: memref<1x128xf32, #tpu.memory_space<vmem>>, %arg6: memref<64x128xbf16, #tpu.memory_space<vmem>>, %arg7: memref<64x128xf32, #tpu.memory_space<vmem>>) attributes {dimension_semantics = [#tpu.dimension_semantics<parallel>, #tpu.dimension_semantics<parallel>, #tpu.dimension_semantics<arbitrary>], iteration_bounds = array<i64: 1, 1, 1>, scalar_prefetch = 0 : i64, scratch_operands = 1 : i64, tpu.core_type = #tpu.core_type<tc>, window_params = [{transform_indices = @transform_0, window_bounds = array<i64: 64, 256>}, {transform_indices = @transform_1, window_bounds = array<i64: 256, 128>}, {transform_indices = @transform_2, window_bounds = array<i64: 1, 128>}, {transform_indices = @transform_3, window_bounds = array<i64: 64, 128>}]} {
    %c0_i32 = arith.constant 0 : i32
    %0 = arith.cmpi eq, %arg2, %c0_i32 : i32
    %1 = arith.extui %0 : i1 to i32
    %c0_i32_0 = arith.constant 0 : i32
    %2 = arith.cmpi ne, %1, %c0_i32_0 : i32
    scf.if %2 {
      %cst_10 = arith.constant 0.000000e+00 : f32
      %12 = vector.broadcast %cst_10 : f32 to vector<64x128xf32>
      %c0_11 = arith.constant 0 : index
      %c0_12 = arith.constant 0 : index
      %13 = vector.load %arg7[%c0_11, %c0_12] : memref<64x128xf32, #tpu.memory_space<vmem>>, vector<64x128xf32>
      tpu.vector_store %arg7[%c0_11, %c0_12], %12 {strides = array<i32>} : memref<64x128xf32, #tpu.memory_space<vmem>>, vector<64x128xf32>,
    } else {
    }
    %c0 = arith.constant 0 : index
    %c0_1 = arith.constant 0 : index
    %3 = vector.load %arg7[%c0, %c0_1] : memref<64x128xf32, #tpu.memory_space<vmem>>, vector<64x128xf32>
    %c0_2 = arith.constant 0 : index
    %c0_3 = arith.constant 0 : index
    %4 = vector.load %arg3[%c0_2, %c0_3] : memref<64x256xbf16, #tpu.memory_space<vmem>>, vector<64x256xbf16>
    %c0_4 = arith.constant 0 : index
    %c0_5 = arith.constant 0 : index
    %5 = vector.load %arg4[%c0_4, %c0_5] : memref<256x128xbf16, #tpu.memory_space<vmem>>, vector<256x128xbf16>
    %cst = arith.constant dense<0.000000e+00> : vector<64x128xf32>
    %6 = tpu.matmul %4, %5, %cst {dimension_numbers = #tpu.dot_dimension_numbers<[1], [0], [0], [1], [0, 0, 1, 1], [], []>} : vector<64x256xbf16>, vector<256x128xbf16>, vector<64x128xf32> -> vector<64x128xf32>
    %7 = arith.addf %3, %6 : vector<64x128xf32>
    %c0_6 = arith.constant 0 : index
    %c0_7 = arith.constant 0 : index
    %8 = vector.load %arg7[%c0_6, %c0_7] : memref<64x128xf32, #tpu.memory_space<vmem>>, vector<64x128xf32>
    tpu.vector_store %arg7[%c0_6, %c0_7], %7 {strides = array<i32>} : memref<64x128xf32, #tpu.memory_space<vmem>>, vector<64x128xf32>,
    %c0_i32_8 = arith.constant 0 : i32
    %9 = arith.cmpi eq, %arg2, %c0_i32_8 : i32
    %10 = arith.extui %9 : i1 to i32
    %c0_i32_9 = arith.constant 0 : i32
    %11 = arith.cmpi ne, %10, %c0_i32_9 : i32
    scf.if %11 {
      %c0_10 = arith.constant 0 : index
      %c0_11 = arith.constant 0 : index
      %12 = vector.load %arg7[%c0_10, %c0_11] : memref<64x128xf32, #tpu.memory_space<vmem>>, vector<64x128xf32>
      %c0_12 = arith.constant 0 : index
      %c0_13 = arith.constant 0 : index
      %13 = vector.load %arg5[%c0_12, %c0_13] : memref<1x128xf32, #tpu.memory_space<vmem>>, vector<1x128xf32>
      %14 = vector.broadcast %13 : vector<1x128xf32> to vector<64x128xf32>
      %15 = arith.addf %12, %14 : vector<64x128xf32>
      %16 = arith.truncf %15 : vector<64x128xf32> to vector<64x128xbf16>
      %c0_14 = arith.constant 0 : index
      %c0_15 = arith.constant 0 : index
      %17 = vector.load %arg6[%c0_14, %c0_15] : memref<64x128xbf16, #tpu.memory_space<vmem>>, vector<64x128xbf16>
      tpu.vector_store %arg6[%c0_14, %c0_15], %16 {strides = array<i32>} : memref<64x128xbf16, #tpu.memory_space<vmem>>, vector<64x128xbf16>,
    } else {
    }
    return
  }
  func.func @transform_0(%arg0: i32, %arg1: i32, %arg2: i32) -> (i32, i32) {
    %c0_i32 = arith.constant 0 : i32
    return %arg0, %arg2 : i32, i32
  }
  func.func @transform_1(%arg0: i32, %arg1: i32, %arg2: i32) -> (i32, i32) {
    %c0_i32 = arith.constant 0 : i32
    return %arg2, %arg1 : i32, i32
  }
  func.func @transform_2(%arg0: i32, %arg1: i32, %arg2: i32) -> (i32, i32) {
    %c0_i32 = arith.constant 0 : i32
    %c0_i32_0 = arith.constant 0 : i32
    return %c0_i32, %arg1 : i32, i32
  }
  func.func @transform_3(%arg0: i32, %arg1: i32, %arg2: i32) -> (i32, i32) {
    %c0_i32 = arith.constant 0 : i32
    return %arg0, %arg1 : i32, i32
  }
}

</mosaic_0001>

<bundles_post_ra>
// kernel: tpu_custom_call.1
= control target key start
LH: loop header
LB: loop body
LE: loop exit
PB: predicated region body
PF: predicated region fallthrough
CT: control target
= control target key end

     0   :  { %8 = vsyncpa [#allocation4], 0  ;;  %s666_s0 = inlined_call_operand.hbm [shape: bf16[64,256], index: 0, kind: input, shape index: {}]   ;;  %s667_s1 = inlined_call_operand.hbm [shape: bf16[256,128], index: 1, kind: input, shape index: {}]   ;;  %s668_s2 = inlined_call_operand.vmem [shape: f32[1,128], index: 2, kind: input, shape index: {}]   ;;  %s669_s3 = inlined_call_operand.hbm [shape: bf16[64,128], index: 3, kind: output, shape index: {}]  }
   0x1   :  { %9 = vsyncpa [#allocation7], 0 }
   0x2   :  { %10 = vsyncpa [#allocation5], 0  ;;  %s15_s14 = sshll.u32 %s666_s0, 4  ;;  %s621_s15 = smov [#allocation3]   ;;  %s16_s14 = int_to_ptr.hbm [resolvable:$true] %s15_s14 }
   0x3   :  { %s17_s16 = sshll.u32 %s621_s15, 4  ;;  %s28_s19 = sshll.u32 %s667_s1, 4  ;;  %s18_s16 = int_to_ptr.vmem [resolvable:$true] %s17_s16  ;;  %s29_s19 = int_to_ptr.hbm [resolvable:$true] %s28_s19 }
   0x4   :  { %s622_s20 = smov 128   ;;  %s623_s21 = smov 8  }
   0x5   :  { %23 = dma.hbm_to_vmem [thread:$0]  %s16_s14, 1024, %s18_s16, [#allocation4], %s622_s20, %s622_s20, %s623_s21  }
   0x6   :  { %s624_s22 = smov [#allocation6]   ;;  %s625_s24 = smov 64  }
   0x7   :  { %s30_s23 = sshll.u32 %s624_s22, 4  ;;  %s626_s25 = smov 4   ;;  %s31_s23 = int_to_ptr.vmem [resolvable:$true] %s30_s23 }
   0x8   :  { %36 = dma.hbm_to_vmem [thread:$0]  %s29_s19, 2048, %s31_s23, [#allocation7], %s625_s24, %s625_s24, %s626_s25  }
   0x9   :  { %615 = dma.done.wait [#allocation4], 1024  }
   0xa   :  { %616 = vsyncadd [#allocation4], 4294966272 }
   0xb   :  { %617 = dma.done.wait [#allocation7], 2048  }
   0xc   :  { %618 = vsyncadd [#allocation7], 4294965248  ;;  %v487_v0 = vld [vmem:[#allocation6 + $0x38] sm:$0xff]  ;;  %v486_v2 = vld [vmem:[#allocation6 + $0x30] sm:$0xff]  ;;  %s362_s29 = sshll.u32 %s669_s3, 4  ;;  %s363_s29 = int_to_ptr.hbm [resolvable:$true] %s362_s29 }
   0xd   :  { %v495_v1 = vld [vmem:[#allocation6 + $0x78] sm:$0xff]  ;;  %243 = vmatpush.bf16.msra.mxu0 %v487_v0  ;;  %519 = vmatpush.bf16.msra.mxu2 %v487_v0  ;;  %v494_v3 = vld [vmem:[#allocation6 + $0x70] sm:$0xff]  ;;  %v485_v4 = vld [vmem:[#allocation6 + $0x28] sm:$0xff] }
   0xe   :  { %272 = vmatpush.bf16.msra.mxu1 %v495_v1  ;;  %527 = vmatpush.bf16.msra.mxu3 %v495_v1  ;;  %v493_v5 = vld [vmem:[#allocation6 + $0x68] sm:$0xff]  ;;  %v484_v6 = vld [vmem:[#allocation6 + $0x20] sm:$0xff]  ;;  %v483_v8 = vld [vmem:[#allocation6 + $0x18] sm:$0xff] }
   0xf   :  { %v492_v7 = vld [vmem:[#allocation6 + $0x60] sm:$0xff]  ;;  %v491_v9 = vld [vmem:[#allocation6 + $0x58] sm:$0xff]  ;;  %v482_v10 = vld [vmem:[#allocation6 + $0x10] sm:$0xff] }
  0x10   :  { %v490_v11 = vld [vmem:[#allocation6 + $0x50] sm:$0xff]  ;;  %v481_v12 = vld [vmem:[#allocation6 + $0x8] sm:$0xff]  ;;  %v480_v14 = vld [vmem:[#allocation6] sm:$0xff] }
  0x11   :  { %244 = vmatpush.bf16.msra.mxu0 %v486_v2  ;;  %520 = vmatpush.bf16.msra.mxu2 %v486_v2  ;;  %v489_v13 = vld [vmem:[#allocation6 + $0x48] sm:$0xff]  ;;  %v488_v15 = vld [vmem:[#allocation6 + $0x40] sm:$0xff]  ;;  %v386_v28 = vld [vmem:[#allocation3 + $0x10] sm:$0xf] }
  0x12   :  { %273 = vmatpush.bf16.msra.mxu1 %v494_v3  ;;  %528 = vmatpush.bf16.msra.mxu3 %v494_v3  ;;  %v378_v16 = vld [vmem:[#allocation3] sm:$0xf]  ;;  %v473_v17 = vld [vmem:[#allocation3 + $0x4] sm:$0xf0]  ;;  %v472_v20 = vld [vmem:[#allocation3 + $0x4] sm:$0xf] }
  0x13   :  { %v394_v18 = vld [vmem:[#allocation3 + $0x20] sm:$0xf]  ;;  %v477_v19 = vld [vmem:[#allocation3 + $0x24] sm:$0xf0]  ;;  %v380_v21 = vld [vmem:[#allocation3 + $0x8] sm:$0xf0]  ;;  %v379_v24 = vor.u32 %v473_v17, %v378_v16 }
  0x14   :  { %v476_v22 = vld [vmem:[#allocation3 + $0x24] sm:$0xf]  ;;  %v396_v23 = vld [vmem:[#allocation3 + $0x28] sm:$0xf0]  ;;  %v395_v25 = vor.u32 %v477_v19, %v394_v18  ;;  %v383_v26 = vor.u32 %v472_v20, %v380_v21  ;;  %v475_v29 = vld [vmem:[#allocation3 + $0x14] sm:$0xf0] }
  0x15   :  { %245 = vmatpush.bf16.msra.mxu0 %v485_v4  ;;  %521 = vmatpush.bf16.msra.mxu2 %v485_v4  ;;  %v399_v27 = vor.u32 %v476_v22, %v396_v23  ;;  %v402_v30 = vld [vmem:[#allocation3 + $0x30] sm:$0xf]  ;;  %v479_v31 = vld [vmem:[#allocation3 + $0x34] sm:$0xf0]  ;;  %v474_v32 = vld [vmem:[#allocation3 + $0x14] sm:$0xf]  ;;  %v387_v36 = vor.u32 %v475_v29, %v386_v28 }
  0x16   :  { %274 = vmatpush.bf16.msra.mxu1 %v493_v5  ;;  %529 = vmatpush.bf16.msra.mxu3 %v493_v5  ;;  %v388_v33 = vld [vmem:[#allocation3 + $0x18] sm:$0xf0]  ;;  %v478_v34 = vld [vmem:[#allocation3 + $0x34] sm:$0xf]  ;;  %v403_v37 = vor.u32 %v479_v31, %v402_v30  ;;  %v542_v45 = vld [vmem:[%s668_s2] ss:$0 sm:$0xff] }
  0x17   :  { %v404_v35 = vld [vmem:[#allocation3 + $0x38] sm:$0xf0]  ;;  %v391_v38 = vor.u32 %v474_v32, %v388_v33  ;;  %s627_s2 = smov [#allocation8]  }
  0x18   :  { %v407_v39 = vor.u32 %v478_v34, %v404_v35  ;;  %s360_s26 = sshll.u32 %s627_s2, 4  ;;  %s361_s26 = int_to_ptr.vmem [resolvable:$true] %s360_s26 }
  0x19   :  { %246 = vmatpush.bf16.msra.mxu0 %v484_v6  ;;  %522 = vmatpush.bf16.msra.mxu2 %v484_v6 }
  0x1a   :  { %275 = vmatpush.bf16.msra.mxu1 %v492_v7  ;;  %530 = vmatpush.bf16.msra.mxu3 %v492_v7 }
  0x1d   :  { %247 = vmatpush.bf16.msra.mxu0 %v483_v8  ;;  %523 = vmatpush.bf16.msra.mxu2 %v483_v8 }
  0x1e   :  { %276 = vmatpush.bf16.msra.mxu1 %v491_v9  ;;  %531 = vmatpush.bf16.msra.mxu3 %v491_v9 }
  0x21   :  { %248 = vmatpush.bf16.msra.mxu0 %v482_v10  ;;  %524 = vmatpush.bf16.msra.mxu2 %v482_v10 }
  0x22   :  { %277 = vmatpush.bf16.msra.mxu1 %v490_v11  ;;  %532 = vmatpush.bf16.msra.mxu3 %v490_v11 }
  0x25   :  { %249 = vmatpush.bf16.msra.mxu0 %v481_v12  ;;  %525 = vmatpush.bf16.msra.mxu2 %v481_v12 }
  0x26   :  { %278 = vmatpush.bf16.msra.mxu1 %v489_v13  ;;  %533 = vmatpush.bf16.msra.mxu3 %v489_v13 }
  0x29   :  { %250 = vmatpush.bf16.msra.mxu0 %v480_v14  ;;  %526 = vmatpush.bf16.msra.mxu2 %v480_v14 }
  0x2a   :  { %279 = vmatpush.bf16.msra.mxu1 %v488_v15  ;;  %534 = vmatpush.bf16.msra.mxu3 %v488_v15 }
  0x2c   :  { %251 = vmatmul.bf16.vlgmr.msra.gmra.mxu0 %v379_v24  ;;  %261 = vmatmul.bf16.vlgmr.msra.gmra.mxu2 %v395_v25 }
  0x2d   :  { %280 = vmatmul.bf16.vlgmr.msra.gmra.mxu1 %v383_v26  ;;  %290 = vmatmul.bf16.vlgmr.msra.gmra.mxu3 %v399_v27 }
  0x3c   :  { %256 = vmatmul.bf16.gmra.mxu0 %v387_v36  ;;  %266 = vmatmul.bf16.gmra.mxu2 %v403_v37 }
  0x3d   :  { %285 = vmatmul.bf16.gmra.mxu1 %v391_v38  ;;  %295 = vmatmul.bf16.gmra.mxu3 %v407_v39 }
  0xa9   :  { %v252_v40 = vpop.f32.mrf.mxu0 }
  0xaa   :  { %v281_v41 = vpop.f32.mrf.mxu1 }
  0xab   :  { %v282_v44 = vadd.f32 %v281_v41, %v252_v40 }
  0xad   :  { %v332_v49 = vadd.f32 %v542_v45, %v282_v44 }
  0xaf   :  { %v262_v42 = vpop.f32.mrf.mxu2 }
  0xb0   :  { %v291_v43 = vpop.f32.mrf.mxu3 }
  0xb1   :  { %v254_v46 = vpop.f32.mrf.mxu0  ;;  %v292_v51 = vadd.f32 %v291_v43, %v262_v42 }
  0xb2   :  { %v283_v47 = vpop.f32.mrf.mxu1 }
  0xb3   :  { %v284_v48 = vadd.f32 %v283_v47, %v254_v46  ;;  %v336_v58 = vadd.f32 %v542_v45, %v292_v51 }
  0xb5   :  { %v333_v50 = vadd.f32 %v542_v45, %v284_v48 }
  0xb7   :  { %v499_v52 = vpack.c.bf16 %v333_v50, %v332_v49  ;;  %v264_v53 = vpop.f32.mrf.mxu2 }
  0xb8   :  { %v293_v54 = vpop.f32.mrf.mxu3 }
  0xb9   :  { %500 = vst [vmem:[#allocation8] sm:$0xff] %v499_v52   ;;  %v294_v55 = vadd.f32 %v293_v54, %v264_v53  ;;  %v257_v56 = vpop.f32.mrf.mxu0 }
  0xba   :  { %v286_v57 = vpop.f32.mrf.mxu1 }
  0xbb   :  { %v337_v59 = vadd.f32 %v542_v45, %v294_v55  ;;  %v287_v63 = vadd.f32 %v286_v57, %v257_v56 }
  0xbd   :  { %v509_v60 = vpack.c.bf16 %v337_v59, %v336_v58  ;;  %v334_v3 = vadd.f32 %v542_v45, %v287_v63 }
  0xbf   :  { %517 = vst [vmem:[#allocation8 + $0x10] sm:$0xff] %v509_v60   ;;  %v267_v61 = vpop.f32.mrf.mxu2 }
  0xc0   :  { %v296_v62 = vpop.f32.mrf.mxu3 }
  0xc1   :  { %v259_v0 = vpop.f32.mrf.mxu0  ;;  %v297_v5 = vadd.f32 %v296_v62, %v267_v61 }
  0xc2   :  { %v288_v1 = vpop.f32.mrf.mxu1 }
  0xc3   :  { %v289_v2 = vadd.f32 %v288_v1, %v259_v0  ;;  %v338_v10 = vadd.f32 %v542_v45, %v297_v5 }
  0xc5   :  { %v335_v4 = vadd.f32 %v542_v45, %v289_v2 }
  0xc7   :  { %v504_v6 = vpack.c.bf16 %v335_v4, %v334_v3  ;;  %v269_v7 = vpop.f32.mrf.mxu2 }
  0xc8   :  { %v298_v8 = vpop.f32.mrf.mxu3 }
  0xc9   :  { %516 = vst [vmem:[#allocation8 + $0x8] sm:$0xff] %v504_v6   ;;  %v299_v9 = vadd.f32 %v298_v8, %v269_v7 }
  0xcb   :  { %v339_v11 = vadd.f32 %v542_v45, %v299_v9 }
  0xcd   :  { %v514_v12 = vpack.c.bf16 %v339_v11, %v338_v10 }
  0xcf   :  { %518 = vst [vmem:[#allocation8 + $0x18] sm:$0xff] %v514_v12  }
  0xd0   :  { %368 = dma.vmem_to_hbm [thread:$0]  %s361_s26, 512, %s363_s29, [#allocation5], %s625_s24, %s625_s24, %s626_s25  }
  0xd1   :  { %619 = dma.done.wait [#allocation5], 512  }
  0xd2   :  { %620 = vsyncadd [#allocation5], 4294966784 }
  0xd3   :  { %373 = vsyncpa [#allocation4], 1 }
  0xd4   :  { %374 = vsyncpa [#allocation7], 1 }
  0xd5   :  { %375 = vsyncpa [#allocation5], 1 }

</bundles_post_ra>
